<compile_context>
chip_gen: v7x
topology: tpu7x:2x2x1
jax: 0.10.0
libtpu: 0.0.40
codegen_flags: <defaults>
</compile_context>

<pallas_src>
import functools

import jax
import jax.numpy as jnp
from jax import lax
from jax.experimental import pallas as pl
from jax.experimental.pallas import tpu as pltpu


def _madex_kernel(x_ref, t_ref, s_ref, num_ref, den_ref, acc_num, acc_den,
                  *, tile_m, mp_total, ragged):
    k = pl.program_id(1)

    @pl.when(k == 0)
    def _():
        acc_num[...] = jnp.zeros_like(acc_num)
        acc_den[...] = jnp.zeros_like(acc_den)

    x = x_ref[...].astype(jnp.float32)[0]        # (2, tile_m, 128)
    t = t_ref[...].astype(jnp.float32)[0]        # (2, tile_m, 128)
    sem = s_ref[...].astype(jnp.float32)[0, 0]   # (tile_m, 128)

    d = jnp.abs(t - x)                           # (2, tile_m, 128)
    part = sem * (d[0] + d[1])                   # numerator contribution

    if ragged:  # static Python bool: only emitted when Mp % tile_m != 0
        rem = mp_total - k * tile_m              # valid rows in this tile
        row = lax.broadcasted_iota(jnp.int32, (tile_m, 128), 0)
        valid = row < rem
        part = jnp.where(valid, part, 0.0)
        sem = jnp.where(valid, sem, 0.0)

    # Pure VPU accumulation; cross-lane reduce deferred to the epilogue.
    acc_num[...] += part
    acc_den[...] += sem

    @pl.when(k == pl.num_programs(1) - 1)
    def _():
        num_ref[...] = jnp.sum(acc_num[...]).reshape(1, 1, 1)
        den_ref[...] = jnp.sum(acc_den[...]).reshape(1, 1, 1)


def madex_loss(inputs, targets, sem_label, *, tile_m=512):
    """inputs/targets: (N, 2C, H, W); sem_label: (N, C, H, W). Returns scalar f32."""
    N, C2, H, W = inputs.shape
    C = C2 // 2
    assert C2 == 2 * C and sem_label.shape == (N, C, H, W)

    lanes = 128
    P = C * H * W

    # Free (contiguous) reshapes: split channels into (half, C) and flatten.
    x = inputs.reshape(N, 2, P)
    t = targets.reshape(N, 2, P)
    s = sem_label.reshape(N, 1, P)

    if P % lanes:
        # Rare fallback: pad <128 tail elements per (n, half) to reach a lane
        # multiple; sem pads with zeros so padding contributes to neither sum.
        pad = (-P) % lanes
        x = jnp.pad(x, ((0, 0), (0, 0), (0, pad)))
        t = jnp.pad(t, ((0, 0), (0, 0), (0, pad)))
        s = jnp.pad(s, ((0, 0), (0, 0), (0, pad)))
        P += pad

    mp = P // lanes
    x = x.reshape(N, 2, mp, lanes)
    t = t.reshape(N, 2, mp, lanes)
    s = s.reshape(N, 1, mp, lanes)

    if mp <= tile_m:
        tile_m = mp                              # full-extent block (always legal)
    else:
        tile_m = max(8, (tile_m // 8) * 8)       # keep sublane-aligned tiles
    k_steps = pl.cdiv(mp, tile_m)
    ragged = (mp % tile_m) != 0

    kernel = functools.partial(_madex_kernel, tile_m=tile_m, mp_total=mp,
                               ragged=ragged)

    num, den = pl.pallas_call(
        kernel,
        out_shape=(jax.ShapeDtypeStruct((N, 1, 1), jnp.float32),
                   jax.ShapeDtypeStruct((N, 1, 1), jnp.float32)),
        grid_spec=pltpu.PrefetchScalarGridSpec(
            num_scalar_prefetch=0,
            grid=(N, k_steps),
            in_specs=[
                pl.BlockSpec((1, 2, tile_m, lanes), lambda n, k: (n, 0, k, 0)),
                pl.BlockSpec((1, 2, tile_m, lanes), lambda n, k: (n, 0, k, 0)),
                # sem block reused for both channel halves (same block index).
                pl.BlockSpec((1, 1, tile_m, lanes), lambda n, k: (n, 0, k, 0)),
            ],
            out_specs=[
                pl.BlockSpec((1, 1, 1), lambda n, k: (n, 0, 0)),
                pl.BlockSpec((1, 1, 1), lambda n, k: (n, 0, 0)),
            ],
            scratch_shapes=[pltpu.VMEM((tile_m, lanes), jnp.float32),
                            pltpu.VMEM((tile_m, lanes), jnp.float32)],
        ),
        # N axis is independent (per-sample partials) -> megacore-splittable on
        # v7x; K carries the accumulator -> "arbitrary".  Default scoped VMEM
        # is ample for tile_m=512 (~3 MiB); set vmem_limit_bytes if tile_m is
        # pushed beyond ~4096 rows.
        compiler_params=pltpu.CompilerParams(
            dimension_semantics=("parallel", "arbitrary")),
    )(x, t, s)

    total_num = jnp.sum(num)
    total_den = 2.0 * jnp.sum(den)   # cat([sem, sem]).sum() == 2 * sem.sum()
    return (total_num / (total_den + 1e-8)).astype(jnp.float32)


def _reference(inputs, targets, sem_label):
    sem = jnp.concatenate([sem_label, sem_label], axis=1)
    loss = sem * jnp.abs(targets - inputs)
    return loss.sum() / (sem.sum() + 1e-8)


if __name__ == "__main__":
    key = jax.random.PRNGKey(0)
    k1, k2, k3 = jax.random.split(key, 3)

    N, C, H, W = 2, 2, 16, 16            # inputs/targets have 2*C channels
    inputs = jax.random.normal(k1, (N, 2 * C, H, W), dtype=jnp.float32)
    targets = jax.random.normal(k2, (N, 2 * C, H, W), dtype=jnp.float32)
    sem_label = (jax.random.uniform(k3, (N, C, H, W)) > 0.5).astype(jnp.float32)

    out = madex_loss(inputs, targets, sem_label)
    out = jax.block_until_ready(out)

    ref = _reference(inputs, targets, sem_label)
    assert jnp.allclose(out, ref, rtol=1e-5, atol=1e-5), (out, ref)

    print("KERNEL_OK")
</pallas_src>

<mosaic_0001>
module attributes {stable_mosaic.version = 11 : i64} {
  func.func @_madex_kernel(%arg0: i32, %arg1: i32, %arg2: memref<1x2x4x128xf32, #tpu.memory_space<vmem>>, %arg3: memref<1x2x4x128xf32, #tpu.memory_space<vmem>>, %arg4: memref<1x1x4x128xf32, #tpu.memory_space<vmem>>, %arg5: memref<1x1x1xf32, #tpu.memory_space<vmem>>, %arg6: memref<1x1x1xf32, #tpu.memory_space<vmem>>, %arg7: memref<4x128xf32, #tpu.memory_space<vmem>>, %arg8: memref<4x128xf32, #tpu.memory_space<vmem>>) attributes {dimension_semantics = [#tpu.dimension_semantics<parallel>, #tpu.dimension_semantics<arbitrary>], iteration_bounds = array<i64: 2, 1>, scalar_prefetch = 0 : i64, scratch_operands = 2 : i64, tpu.core_type = #tpu.core_type<tc>, window_params = [{transform_indices = @transform_0, window_bounds = array<i64: 1, 2, 4, 128>}, {transform_indices = @transform_1, window_bounds = array<i64: 1, 2, 4, 128>}, {transform_indices = @transform_2, window_bounds = array<i64: 1, 1, 4, 128>}, {transform_indices = @transform_3, window_bounds = array<i64: 1, 1, 1>}, {transform_indices = @transform_4, window_bounds = array<i64: 1, 1, 1>}]} {
    %c0_i32 = arith.constant 0 : i32
    %0 = arith.cmpi eq, %arg1, %c0_i32 : i32
    %1 = arith.extui %0 : i1 to i32
    %c0_i32_0 = arith.constant 0 : i32
    %2 = arith.cmpi ne, %1, %c0_i32_0 : i32
    scf.if %2 {
      %cst = arith.constant 0.000000e+00 : f32
      %26 = vector.broadcast %cst : f32 to vector<4x128xf32>
      %c0_22 = arith.constant 0 : index
      %c0_23 = arith.constant 0 : index
      %27 = vector.load %arg7[%c0_22, %c0_23] : memref<4x128xf32, #tpu.memory_space<vmem>>, vector<4x128xf32>
      tpu.vector_store %arg7[%c0_22, %c0_23], %26 {strides = array<i32>} : memref<4x128xf32, #tpu.memory_space<vmem>>, vector<4x128xf32>,
      %cst_24 = arith.constant 0.000000e+00 : f32
      %28 = vector.broadcast %cst_24 : f32 to vector<4x128xf32>
      %c0_25 = arith.constant 0 : index
      %c0_26 = arith.constant 0 : index
      %29 = vector.load %arg8[%c0_25, %c0_26] : memref<4x128xf32, #tpu.memory_space<vmem>>, vector<4x128xf32>
      tpu.vector_store %arg8[%c0_25, %c0_26], %28 {strides = array<i32>} : memref<4x128xf32, #tpu.memory_space<vmem>>, vector<4x128xf32>,
    } else {
    }
    %c0 = arith.constant 0 : index
    %c0_1 = arith.constant 0 : index
    %c0_2 = arith.constant 0 : index
    %c0_3 = arith.constant 0 : index
    %3 = vector.load %arg2[%c0, %c0_1, %c0_2, %c0_3] : memref<1x2x4x128xf32, #tpu.memory_space<vmem>>, vector<1x2x4x128xf32>
    %4 = vector.shape_cast %3 : vector<1x2x4x128xf32> to vector<2x4x128xf32>
    %c0_4 = arith.constant 0 : index
    %c0_5 = arith.constant 0 : index
    %c0_6 = arith.constant 0 : index
    %c0_7 = arith.constant 0 : index
    %5 = vector.load %arg3[%c0_4, %c0_5, %c0_6, %c0_7] : memref<1x2x4x128xf32, #tpu.memory_space<vmem>>, vector<1x2x4x128xf32>
    %6 = vector.shape_cast %5 : vector<1x2x4x128xf32> to vector<2x4x128xf32>
    %c0_8 = arith.constant 0 : index
    %c0_9 = arith.constant 0 : index
    %c0_10 = arith.constant 0 : index
    %c0_11 = arith.constant 0 : index
    %7 = vector.load %arg4[%c0_8, %c0_9, %c0_10, %c0_11] : memref<1x1x4x128xf32, #tpu.memory_space<vmem>>, vector<1x1x4x128xf32>
    %8 = vector.shape_cast %7 : vector<1x1x4x128xf32> to vector<4x128xf32>
    %9 = arith.subf %6, %4 : vector<2x4x128xf32>
    %10 = math.absf %9 : vector<2x4x128xf32>
    %11 = vector.extract_strided_slice %10 {offsets = [0, 0, 0], sizes = [1, 4, 128], strides = [1, 1, 1]} : vector<2x4x128xf32> to vector<1x4x128xf32>
    %12 = vector.shape_cast %11 : vector<1x4x128xf32> to vector<4x128xf32>
    %13 = vector.extract_strided_slice %10 {offsets = [1, 0, 0], sizes = [1, 4, 128], strides = [1, 1, 1]} : vector<2x4x128xf32> to vector<1x4x128xf32>
    %14 = vector.shape_cast %13 : vector<1x4x128xf32> to vector<4x128xf32>
    %15 = arith.addf %12, %14 : vector<4x128xf32>
    %16 = arith.mulf %8, %15 : vector<4x128xf32>
    %c0_12 = arith.constant 0 : index
    %c0_13 = arith.constant 0 : index
    %17 = vector.load %arg7[%c0_12, %c0_13] : memref<4x128xf32, #tpu.memory_space<vmem>>, vector<4x128xf32>
    %18 = arith.addf %17, %16 : vector<4x128xf32>
    %c0_14 = arith.constant 0 : index
    %c0_15 = arith.constant 0 : index
    %19 = vector.load %arg7[%c0_14, %c0_15] : memref<4x128xf32, #tpu.memory_space<vmem>>, vector<4x128xf32>
    tpu.vector_store %arg7[%c0_14, %c0_15], %18 {strides = array<i32>} : memref<4x128xf32, #tpu.memory_space<vmem>>, vector<4x128xf32>,
    %c0_16 = arith.constant 0 : index
    %c0_17 = arith.constant 0 : index
    %20 = vector.load %arg8[%c0_16, %c0_17] : memref<4x128xf32, #tpu.memory_space<vmem>>, vector<4x128xf32>
    %21 = arith.addf %20, %8 : vector<4x128xf32>
    %c0_18 = arith.constant 0 : index
    %c0_19 = arith.constant 0 : index
    %22 = vector.load %arg8[%c0_18, %c0_19] : memref<4x128xf32, #tpu.memory_space<vmem>>, vector<4x128xf32>
    tpu.vector_store %arg8[%c0_18, %c0_19], %21 {strides = array<i32>} : memref<4x128xf32, #tpu.memory_space<vmem>>, vector<4x128xf32>,
    %c0_i32_20 = arith.constant 0 : i32
    %23 = arith.cmpi eq, %arg1, %c0_i32_20 : i32
    %24 = arith.extui %23 : i1 to i32
    %c0_i32_21 = arith.constant 0 : i32
    %25 = arith.cmpi ne, %24, %c0_i32_21 : i32
    scf.if %25 {
      %c0_22 = arith.constant 0 : index
      %c0_23 = arith.constant 0 : index
      %26 = vector.load %arg7[%c0_22, %c0_23] : memref<4x128xf32, #tpu.memory_space<vmem>>, vector<4x128xf32>
      %27 = vector.shape_cast %26 : vector<4x128xf32> to vector<1x4x128xf32>
      %cst = arith.constant dense<0.000000e+00> : vector<1xf32>
      %28 = vector.multi_reduction <add>, %27, %cst [1, 2] : vector<1x4x128xf32> to vector<1xf32>
      %29 = vector.shape_cast %28 : vector<1xf32> to vector<1x1x1xf32>
      %30 = vector.extract %29[0, 0, 0] : f32 from vector<1x1x1xf32>
      %31 = vector.broadcast %30 : f32 to vector<1x1x1xf32>
      %c0_24 = arith.constant 0 : index
      %c0_25 = arith.constant 0 : index
      %c0_26 = arith.constant 0 : index
      %32 = vector.load %arg5[%c0_24, %c0_25, %c0_26] : memref<1x1x1xf32, #tpu.memory_space<vmem>>, vector<1x1x1xf32>
      tpu.vector_store %arg5[%c0_24, %c0_25, %c0_26], %31 {strides = array<i32>} : memref<1x1x1xf32, #tpu.memory_space<vmem>>, vector<1x1x1xf32>,
      %c0_27 = arith.constant 0 : index
      %c0_28 = arith.constant 0 : index
      %33 = vector.load %arg8[%c0_27, %c0_28] : memref<4x128xf32, #tpu.memory_space<vmem>>, vector<4x128xf32>
      %34 = vector.shape_cast %33 : vector<4x128xf32> to vector<1x4x128xf32>
      %cst_29 = arith.constant dense<0.000000e+00> : vector<1xf32>
      %35 = vector.multi_reduction <add>, %34, %cst_29 [1, 2] : vector<1x4x128xf32> to vector<1xf32>
      %36 = vector.shape_cast %35 : vector<1xf32> to vector<1x1x1xf32>
      %37 = vector.extract %36[0, 0, 0] : f32 from vector<1x1x1xf32>
      %38 = vector.broadcast %37 : f32 to vector<1x1x1xf32>
      %c0_30 = arith.constant 0 : index
      %c0_31 = arith.constant 0 : index
      %c0_32 = arith.constant 0 : index
      %39 = vector.load %arg6[%c0_30, %c0_31, %c0_32] : memref<1x1x1xf32, #tpu.memory_space<vmem>>, vector<1x1x1xf32>
      tpu.vector_store %arg6[%c0_30, %c0_31, %c0_32], %38 {strides = array<i32>} : memref<1x1x1xf32, #tpu.memory_space<vmem>>, vector<1x1x1xf32>,
    } else {
    }
    return
  }
  func.func @transform_0(%arg0: i32, %arg1: i32) -> (i32, i32, i32, i32) {
    %c0_i32 = arith.constant 0 : i32
    %c0_i32_0 = arith.constant 0 : i32
    %c0_i32_1 = arith.constant 0 : i32
    return %arg0, %c0_i32, %arg1, %c0_i32_0 : i32, i32, i32, i32
  }
  func.func @transform_1(%arg0: i32, %arg1: i32) -> (i32, i32, i32, i32) {
    %c0_i32 = arith.constant 0 : i32
    %c0_i32_0 = arith.constant 0 : i32
    %c0_i32_1 = arith.constant 0 : i32
    return %arg0, %c0_i32, %arg1, %c0_i32_0 : i32, i32, i32, i32
  }
  func.func @transform_2(%arg0: i32, %arg1: i32) -> (i32, i32, i32, i32) {
    %c0_i32 = arith.constant 0 : i32
    %c0_i32_0 = arith.constant 0 : i32
    %c0_i32_1 = arith.constant 0 : i32
    return %arg0, %c0_i32, %arg1, %c0_i32_0 : i32, i32, i32, i32
  }
  func.func @transform_3(%arg0: i32, %arg1: i32) -> (i32, i32, i32) {
    %c0_i32 = arith.constant 0 : i32
    %c0_i32_0 = arith.constant 0 : i32
    %c0_i32_1 = arith.constant 0 : i32
    return %arg0, %c0_i32, %c0_i32_0 : i32, i32, i32
  }
  func.func @transform_4(%arg0: i32, %arg1: i32) -> (i32, i32, i32) {
    %c0_i32 = arith.constant 0 : i32
    %c0_i32_0 = arith.constant 0 : i32
    %c0_i32_1 = arith.constant 0 : i32
    return %arg0, %c0_i32, %c0_i32_0 : i32, i32, i32
  }
}

</mosaic_0001>

<bundles_post_ra>
// kernel: tpu_custom_call.1
= control target key start
LH: loop header
LB: loop body
LE: loop exit
PB: predicated region body
PF: predicated region fallthrough
CT: control target
= control target key end

     0   :  { %10 = vsyncpa [#allocation5], 0  ;;  %s996_s0 = inlined_call_operand.hbm [shape: f32[2,2,4,128], index: 0, kind: input, shape index: {}]   ;;  %s997_s1 = inlined_call_operand.hbm [shape: f32[2,2,4,128], index: 1, kind: input, shape index: {}]   ;;  %s998_s2 = inlined_call_operand.hbm [shape: f32[2,1,4,128], index: 2, kind: input, shape index: {}]   ;;  %s999_s3 = inlined_call_operand.vmem [shape: f32[2,1,1], index: 3, kind: output, shape index: {0}]   ;;  %s1000_s4 = inlined_call_operand.vmem [shape: f32[2,1,1], index: 4, kind: output, shape index: {1}]  }
   0x1   :  { %12 = vsyncpa [#allocation5 + $0x1], 0 }
   0x2   :  { %13 = vsyncpa [#allocation7], 0 }
   0x3   :  { %15 = vsyncpa [#allocation7 + $0x1], 0  ;;  %s781_s15 = smov 0   ;;  %s783_s16 = smov 0  }
   0x4   :  { %s785_s17 = smov 0   ;;  %s787_s18 = smov 0  }
   0x5   :  { %s789_s19 = smov 0   ;;  %s791_s20 = smov 0  }
   0x6 LB: > { %s1002_s21 = sadd.s32 4294967295, %s748_s20   ;;  %s33_s22 = sadd.s32 1, %s744_s19  ;;  %s748_s20 = sphi %s791_s20, %s21_s20   ;;  %s744_s19 = sphi %s789_s19, %s1019_s19   ;;  %s740_s18 = sphi %s787_s18, %s1018_s18   ;;  %s736_s17 = sphi %s785_s17, %s1017_s17   ;;  %s732_s16 = sphi %s783_s16, %s1016_s16   ;;  %s728_s15 = sphi %s781_s15, %s1015_s15  }
   0x7   : > { %p35_p0 = scmp.ge.s32.totalorder %s33_s22, 2  ;;  %s42_s23 = sadd.s32 1, %s736_s17 }
   0x8   : > { %p49_p1 = scmp.ne.s32.totalorder %s736_s17, %s732_s16  ;;  %p50_p2 = scmp.eq.s32.totalorder %s748_s20, 0 }
   0x9   : > { %s1021_s22 = smov (%p35_p0, %s33_s22), 0  ;;  %p55_p4 = scmp.ne.s32.totalorder %s732_s16, %s728_s15 }
   0xa   : > { %p51_p3 = por %p50_p2, %p49_p1  ;;  %s37_s24 = ssub.s32 %s744_s19, %s1021_s22 }
   0xb   : > { %p56_p5 = scmp.eq.s32.totalorder %s1002_s21, 0  ;;  %p40_p6 = scmp.eq.s32.totalorder %s37_s24, 0 }
   0xc   : > { %p552_p8 = scmp.lt.s32.totalorder %s748_s20, 2  ;;  %s831_s27 = sand.u32 1, %s736_s17  }
   0xd   : > { %p822_p7 = por %p56_p5, %p55_p4  ;;  %s530_s28 = sshll.u32 %s744_s19, 7 }
   0xe   : > { %s828_s26 = scalar_select %p40_p6, %s736_s17, %s42_s23  }
   0xf   : > { %s1005_s25 = scalar_select %p822_p7, 1, 0 }
  0x10   : > { %s516_s29 = sshll.u32 %s831_s27, 3  ;;  %p835_p9 = pnand %p552_p8, %p51_p3 }
  0x11   : > { %s209_s5 = sand.u32 1, %s748_s20   ;;  %s845_s8 = scalar_lea.hbm %s997_s1, %s530_s28 }
  0x12   : > { %s1006_s30 = scalar_select %p835_p9, 1, 0 }
  0x13   : > { %s213_s9 = scalar_lea.vmem [#allocation6], %s516_s29  ;;  %s852_s11 = scalar_lea.sflag [#allocation7], %s209_s5 }
  0x14   : > { %s221_s10 = sshll.u32 %s213_s9, 4  ;;  %s604_s12 = scalar_lea.hbm %s845_s8, 128  ;;  %s849_s10 = int_to_ptr.vmem [resolvable:$true] %s221_s10 }
  0x15   : > { %p605_p11 = scmp.ne.s32.totalorder %s845_s8, %s604_s12  ;;  %p858_p12 = pneg %p835_p9 }
  0x16   : > { %s609_s23 = scalar_lea.hbm %s997_s1, 256  ;;  %p610_p1 = scmp.lt.u32.totalorder %s845_s8, %s997_s1 }
  0x17   : > { %p607_p13 = pnand %p858_p12, %p605_p11  ;;  %p611_p2 = scmp.lt.u32.totalorder %s609_s23, %s604_s12 }
  0x18   : > { %p613_p4 = scmp.lt.u32.totalorder %s604_s12, %s845_s8 }
  0x19   : > { %p608_p0 = pneg %p607_p13  ;;  %p612_p3 = por %p611_p2, %p610_p1 }
  0x1b   : > { %p614_p5 = por %p613_p4, %p612_p3 }
  0x1d   : > { %p615_p6 = pnand %p614_p5, %p608_p0 }
  0x1f   : > { %618 = shalt.err (!%p615_p6)
}
  0x20   : > { %s619_s5 = scalar_lea.vmem %s849_s10, 128  ;;  %s750_s7 = smov [#allocation6]  }
  0x21   : > { %p620_p8 = scmp.ne.s32.totalorder %s849_s10, %s619_s5  ;;  %s624_s9 = sshll.u32 %s750_s7, 4  ;;  %s625_s9 = int_to_ptr.vmem [resolvable:$false] %s624_s9 }
  0x22   : > { %s626_s14 = scalar_lea.vmem %s625_s9, 256  ;;  %p627_p10 = scmp.lt.s32.totalorder %s849_s10, %s625_s9 }
  0x23   : > { %p622_p11 = pnand %p620_p8, %p858_p12  ;;  %p628_p7 = scmp.lt.s32.totalorder %s626_s14, %s619_s5 }
  0x25   : > { %p623_p13 = pneg %p622_p11  ;;  %p629_p1 = por %p628_p7, %p627_p10 }
  0x27   : > { %p630_p2 = pnand %p629_p1, %p623_p13 }
  0x29   : > { %633 = shalt.err (!%p630_p2)
}
  0x2a   : > { %s1003_s12 = smov 64   ;;  %s752_s15 = smov 4  }
  0x2b   : > { %548 = dma.hbm_to_vmem [thread:$0]  (!%p835_p9), %s845_s8, 128, %s849_s10, %s852_s11, %s1003_s12, %s1003_s12, %s752_s15  }
  0x2c   : > { %p248_p7 = scmp.lt.s32.totalorder %s748_s20, 3  ;;  %p1008_p10 = scmp.ge.s32.totalorder %s748_s20, 1 }
  0x2d   : > { %s897_s5 = scalar_lea.hbm %s996_s0, %s530_s28  ;;  %s191_s7 = scalar_lea.vmem [#allocation4], %s516_s29 }
  0x2e   : > { %p888_p0 = pnand %p1008_p10, %p248_p7  ;;  %s199_s9 = sshll.u32 %s191_s7, 4  ;;  %s901_s9 = int_to_ptr.vmem [resolvable:$true] %s199_s9 }
  0x2f   : > { %s522_s8 = sshll.u32 %s831_s27, 2  ;;  %s188_s10 = scalar_lea.sflag [#allocation5], %s831_s27 }
  0x30   : > { %s1009_s23 = scalar_select %p888_p0, 1, 0 }
  0x31   : > { %s634_s14 = scalar_lea.hbm %s897_s5, 128  ;;  %s639_s28 = scalar_lea.hbm %s996_s0, 256 }
  0x32   : > { %p635_p3 = scmp.ne.s32.totalorder %s897_s5, %s634_s14  ;;  %p640_p6 = scmp.lt.u32.totalorder %s897_s5, %s996_s0 }
  0x33   : > { %p641_p8 = scmp.lt.u32.totalorder %s639_s28, %s634_s14  ;;  %p643_p13 = scmp.lt.u32.totalorder %s634_s14, %s897_s5 }
  0x34   : > { %p637_p4 = pnand %p635_p3, %p858_p12 }
  0x35   : > { %p642_p11 = por %p641_p8, %p640_p6 }
  0x36   : > { %p638_p5 = pneg %p637_p4 }
  0x37   : > { %p644_p1 = por %p643_p13, %p642_p11 }
  0x39   : > { %p645_p2 = pnand %p644_p1, %p638_p5 }
  0x3b   : > { %648 = shalt.err (!%p645_p2)
}
  0x3c   : > { %s649_s29 = scalar_lea.vmem %s901_s9, 128  ;;  %s753_s21 = smov [#allocation4]  }
  0x3d   : > { %p650_p7 = scmp.ne.s32.totalorder %s901_s9, %s649_s29  ;;  %s654_s7 = sshll.u32 %s753_s21, 4  ;;  %s655_s7 = int_to_ptr.vmem [resolvable:$false] %s654_s7 }
  0x3e   : > { %s656_s12 = scalar_lea.vmem %s655_s7, 256  ;;  %p657_p4 = scmp.lt.s32.totalorder %s901_s9, %s655_s7 }
  0x3f   : > { %p652_p10 = pnand %p650_p7, %p858_p12  ;;  %p658_p0 = scmp.lt.s32.totalorder %s656_s12, %s649_s29 }
  0x41   : > { %p653_p3 = pneg %p652_p10  ;;  %p659_p6 = por %p658_p0, %p657_p4 }
  0x43   : > { %p660_p8 = pnand %p659_p6, %p653_p3 }
  0x45   : > { %663 = shalt.err (!%p660_p8)
}
  0x46   : > { %s1010_s14 = smov 64   ;;  %s523_s24 = sshll.u32 %s744_s19, 6 }
  0x47   : > { %545 = dma.hbm_to_vmem [thread:$0]  (!%p835_p9), %s897_s5, 128, %s901_s9, %s188_s10, %s1010_s14, %s1010_s14, %s752_s15  }
  0x48   : > { %s935_s29 = scalar_lea.hbm %s998_s2, %s523_s24  ;;  %s235_s21 = scalar_lea.vmem [#allocation8], %s522_s8 }
  0x49   : > { %s243_s7 = sshll.u32 %s235_s21, 4  ;;  %s664_s12 = scalar_lea.hbm %s935_s29, 64  ;;  %s244_s7 = int_to_ptr.vmem [resolvable:$true] %s243_s7 }
  0x4a   : > { %p665_p0 = scmp.ne.s32.totalorder %s935_s29, %s664_s12  ;;  %s669_s9 = scalar_lea.hbm %s998_s2, 128 }
  0x4b   : > { %p670_p13 = scmp.lt.u32.totalorder %s935_s29, %s998_s2  ;;  %p671_p1 = scmp.lt.u32.totalorder %s669_s9, %s664_s12 }
  0x4c   : > { %p667_p5 = pnand %p665_p0, %p858_p12  ;;  %p673_p7 = scmp.lt.u32.totalorder %s664_s12, %s935_s29 }
  0x4d   : > { %p672_p2 = por %p671_p1, %p670_p13 }
  0x4e   : > { %p668_p11 = pneg %p667_p5 }
  0x4f   : > { %p674_p10 = por %p673_p7, %p672_p2 }
  0x51   : > { %p675_p3 = pnand %p674_p10, %p668_p11 }
  0x53   : > { %678 = shalt.err (!%p675_p3)
}
  0x54   : > { %s679_s27 = scalar_lea.vmem %s244_s7, 64  ;;  %s754_s8 = smov [#allocation8]  }
  0x55   : > { %p680_p4 = scmp.ne.s32.totalorder %s244_s7, %s679_s27  ;;  %s684_s24 = sshll.u32 %s754_s8, 4  ;;  %s685_s24 = int_to_ptr.vmem [resolvable:$false] %s684_s24 }
  0x56   : > { %s686_s28 = scalar_lea.vmem %s685_s24, 128  ;;  %p687_p0 = scmp.lt.s32.totalorder %s244_s7, %s685_s24 }
  0x57   : > { %p682_p6 = pnand %p680_p4, %p858_p12  ;;  %p688_p5 = scmp.lt.s32.totalorder %s686_s28, %s679_s27 }
  0x59   : > { %p683_p8 = pneg %p682_p6  ;;  %p689_p9 = por %p688_p5, %p687_p0 }
  0x5b   : > { %p690_p1 = pnand %p689_p9, %p683_p8 }
  0x5d   : > { %693 = shalt.err (!%p690_p1)
}
  0x5e   : > { %p1011_p13 = scmp.ne.s32.totalorder %s1006_s30, 0  ;;  %p1012_p11 = scmp.ne.s32.totalorder %s1009_s23, 0 }
  0x5f   : > { %s254_s13 = sand.u32 (!%p1012_p11), 1, %s732_s16   ;;  %p1013_p12 = scmp.ne.s32.totalorder (!%p1012_p11), %s1005_s25, 0 }
  0x60   : > { %551 = dma.hbm_to_vmem [thread:$0]  (!%p1011_p13), %s935_s29, 64, %s244_s7, %s852_s11  }
  0x61   : > { %252 = sbr.rel (%p1012_p11) target bundleno = 341 (0x155), region = 32  ;;  %s525_s6 = sshll.u32 (!%p1012_p11), %s254_s13, 3 }
  0x62   : > { %s255_s21 = scalar_lea.sflag (!%p1012_p11), [#allocation5], %s254_s13  ;;  %s258_s12 = scalar_lea.vmem (!%p1012_p11), [#allocation4], %s525_s6 }
  0x68   : > { %719 = dma.done.wait (%p1013_p12), %s255_s21, 128  }
  0x69   : > { %721 = vsyncadd (%p1013_p12), %s255_s21, 4294967168  ;;  %s1014_s15 = sadd.s32 4294967295, %s748_s20   ;;  %s267_s11 = scalar_lea.vmem [#allocation6], %s525_s6 }
  0x6a   : > { %s263_s30 = sand.u32 1, %s1014_s15  }
  0x6b   : > { %s264_s5 = scalar_lea.sflag [#allocation7], %s263_s30 }
  0x6c   : > { %723 = dma.done.wait (%p1013_p12), %s264_s5, 192  }
  0x6d   : > { %725 = vsyncadd (%p1013_p12), %s264_s5, 4294967104  ;;  %v755_v0 = vmov 0.0   ;;  %s527_s23 = sshll.u32 %s254_s13, 2  ;;  %v324_v1 = vld [vmem:[%s258_s12] sm:$0xf]  ;;  %vm345_vm0 = vcmask 1043456  }
  0x6e   : > { %322 = vst [vmem:[#allocation2] sm:$0xf] %v755_v0  ;;  %323 = vst [vmem:[#allocation3] sm:$0xf] %v755_v0  ;;  %v325_v2 = vld [vmem:[%s258_s12 + $0x4] sm:$0xf] }
  0x6f   : > { %v326_v3 = vld [vmem:[%s267_s11] sm:$0xf]  ;;  %v327_v4 = vld [vmem:[%s267_s11 + $0x4] sm:$0xf]  ;;  %s276_s29 = scalar_lea.vmem [#allocation8], %s527_s23  ;;  %p312_p9 = scmp.lt.s32.totalorder %s740_s18, 1 }
  0x70   : > { %v329_v5 = vsub.f32 %v326_v3, %v324_v1  ;;  %v328_v6 = vld [vmem:[%s276_s29] sm:$0xf]  ;;  %v330_v7 = vsub.f32 %v327_v4, %v325_v2  ;;  %vm357_vm1 = vcmask 0  }
  0x71   : > { %s1023_s18 = smov (!%p312_p9, %s740_s18), 1 }
  0x72   : > { %v331_v9 = vand.u32 2147483647, %v329_v5  ;;  %v332_v11 = vand.u32 2147483647, %v330_v7  ;;  %s314_s9 = scalar_lea.vmem %s999_s3, %s1023_s18  ;;  %s317_s8 = scalar_lea.vmem %s1000_s4, %s1023_s18 }
  0x74   : > { %v333_v12 = vadd.f32 %v332_v11, %v331_v9 }
  0x75   : > { %v338_v8 = vld [vmem:[#allocation3] sm:$0xf]  ;;  %v335_v13 = vld [vmem:[#allocation2] sm:$0xf] }
  0x76   : > { %v339_v10 = vadd.f32 %v338_v8, %v328_v6  ;;  %v334_v14 = vmul.f32 %v333_v12, %v328_v6 }
  0x78   : > { %340 = vst [vmem:[#allocation3] sm:$0xf] %v339_v10  ;;  %v336_v15 = vadd.f32 %v335_v13, %v334_v14 }
  0x7a   : > { %337 = vst [vmem:[#allocation2] sm:$0xf] %v336_v15 }
  0x7f   : > { %v359_v17 = vld [vmem:[#allocation3] sm:$0xf] }
  0x80   : > { %v360_v19 = vsel %vm345_vm0, %v359_v17, 0.0 }
  0x81   : > { %v344_v16 = vld [vmem:[#allocation2] sm:$0xf] }
  0x82   : > { %v346_v18 = vsel %vm345_vm0, %v344_v16, 0.0 }
  0x83   : > { %347 = vadd.xlane.f32.xlu0 %v346_v18 }
  0x87   : > { %361 = vadd.xlane.f32.xlu0 %v360_v19 }
 0x110   : > { %v348_v20 = vpop.xlane.xlu0 %347 }
 0x111   : > { %v349_v21 = vrot.slane %v348_v20, 4 }
 0x113   : > { %v350_v22 = vadd.f32 %v349_v21, %v348_v20 }
 0x114   : > { %v362_v23 = vpop.xlane.xlu0 %361 }
 0x115   : > { %v351_v24 = vrot.slane %v350_v22, 2  ;;  %v363_v25 = vrot.slane %v362_v23, 4 }
 0x117   : > { %v364_v26 = vadd.f32 %v363_v25, %v362_v23  ;;  %v352_v27 = vadd.f32 %v351_v24, %v350_v22 }
 0x119   : > { %v365_v28 = vrot.slane %v364_v26, 2  ;;  %v353_v29 = vrot.slane %v352_v27, 1 }
 0x11b   : > { %v366_v30 = vadd.f32 %v365_v28, %v364_v26  ;;  %v354_v31 = vadd.f32 %v353_v29, %v352_v27 }
 0x11d   : > { %532 = vpush %v354_v31  ;;  %v367_v32 = vrot.slane %v366_v30, 1 }
 0x11f   : > { %v368_v33 = vadd.f32 %v367_v32, %v366_v30 }
 0x121   : > { %534 = vpush %v368_v33 }
 0x14e   : > { %s533_s10 = spop %532 }
 0x14f   : > { %v356_v34 = vstv %s533_s10 }
 0x150   : > { %358 = vst.msk [vmem:[%s314_s9] sm:$0x1] %vm357_vm1, %v356_v34 }
 0x152   : > { %s535_s24 = spop %534 }
 0x153   : > { %v370_v35 = vstv %s535_s24 }
 0x154   : > { %371 = vst.msk [vmem:[%s317_s8] sm:$0x1] %vm357_vm1, %v370_v35 }
 0x155 PF: > { %s21_s20 = sadd.s32 1, %s748_s20   ;;  %s1015_s15 = smov %s732_s16 }
 0x156   : > { %p18_p2 = scmp.ge.s32.totalorder %s21_s20, 4   ;;  %s1016_s16 = smov %s736_s17 }
 0x157   : > { %s1017_s17 = smov %s828_s26  ;;  %s1018_s18 = smov %s744_s19 }
 0x158   : > { %s1019_s19 = smov %s1021_s22  ;;  %20 = sbr.rel (!%p18_p2) target bundleno = 6 (0x6), region = 116 }
 0x15f   :  { %401 = vsyncpa [#allocation5], 1 }
 0x160   :  { %403 = vsyncpa [#allocation5 + $0x1], 1 }
 0x161   :  { %404 = vsyncpa [#allocation7], 1 }
 0x162   :  { %406 = vsyncpa [#allocation7 + $0x1], 1 }

</bundles_post_ra>
